<compile_context>
chip_gen: v6e
topology: v6e:2x2x1
jax: 0.10.0
libtpu: 0.0.40
codegen_flags: <defaults>
</compile_context>

<pallas_src>
import functools

import jax
import jax.numpy as jnp
from jax.experimental import pallas as pl
from jax.experimental.pallas import tpu as pltpu

_LANE = 128
_SUBLANE = 8


def _highway_kernel(x_ref, wh_ref, wt_ref, bh_ref, bt_ref, o_ref, *, tn, col_tiled):
    """Computes one (block_b, tn) output tile of the highway layer."""
    x = x_ref[...]                                   # (block_b, F), activation dtype (f32)
    xm = x.astype(wh_ref.dtype)                      # matmul operand (f32 or bf16)
    # Two MXU matmuls with f32 accumulation: (block_b, F) @ (F, tn).
    ph = jnp.dot(xm, wh_ref[...], preferred_element_type=jnp.float32) + bh_ref[...]
    pt = jnp.dot(xm, wt_ref[...], preferred_element_type=jnp.float32) + bt_ref[...]
    h = jnp.maximum(ph, 0.0)                         # relu branch (VPU)
    t = jax.nn.sigmoid(pt)                           # gate branch (EUP exp/recip)
    if col_tiled:
        # Residual slab must align with the output column tile j.
        j = pl.program_id(0)
        xr = x_ref[:, pl.ds(pl.multiple_of(j * tn, _LANE), tn)]
    else:
        xr = x
    xr = xr.astype(jnp.float32)
    # t*h + (1-t)*x  ==  t*(h - x) + x   (one fewer VPU op per element)
    o_ref[...] = (t * (h - xr) + xr).astype(o_ref.dtype)


def prepare_highway_params(wh, bh, wt, bt, *, matmul_dtype=None):
    """One-time parameter prep — call at init time, NOT per forward.

    wh, wt: (F, F) nn.Linear weights in PyTorch (out_features, in_features) layout.
    bh, bt: (F,) biases.
    Returns (wh_t, bh, wt_t, bt): weights transposed to (in, out) layout so the
    kernel computes x @ W, cast once to `matmul_dtype` (default: keep dtype);
    biases reshaped to (1, F) float32.
    """
    wdt = matmul_dtype if matmul_dtype is not None else jnp.asarray(wh).dtype
    wh_t = jnp.asarray(wh).T.astype(wdt)
    wt_t = jnp.asarray(wt).T.astype(wdt)
    bh2 = jnp.asarray(bh).reshape(1, -1).astype(jnp.float32)
    bt2 = jnp.asarray(bt).reshape(1, -1).astype(jnp.float32)
    return wh_t, bh2, wt_t, bt2


def _default_block_b(B, F, x_itemsize):
    # >= 512 rows (when B allows) so per-step MXU work amortizes the ~0.35 us
    # grid-step overhead; cap the x slab at ~4 MiB so VMEM stays comfortable.
    target = max(512, (4 << 20) // max(1, F * x_itemsize))
    if B <= target:
        return B
    return max(_SUBLANE, (min(target, B) // _SUBLANE) * _SUBLANE)


def _default_tn(F, w_itemsize, weight_budget_bytes=24 << 20):
    # Largest column tile (multiple of 128, dividing F) whose Wh+Wt blocks fit a
    # conservative budget assuming default double-buffering by the pipeline.
    full = 2 * 2 * F * F * w_itemsize
    if full <= weight_budget_bytes or F % _LANE != 0:
        return F
    n = F // _LANE
    for k in range(n, 0, -1):
        if n % k == 0 and 2 * 2 * F * (k * _LANE) * w_itemsize <= weight_budget_bytes:
            return k * _LANE
    return _LANE


def _vmem_limit_bytes(block_b, F, tn, x_itemsize, w_itemsize, out_itemsize):
    x_buf = 2 * block_b * F * x_itemsize           # double-buffered x tile
    o_buf = 2 * block_b * tn * out_itemsize        # double-buffered out tile
    w_buf = 2 * 2 * F * tn * w_itemsize            # Wh + Wt blocks, double-buffered
    b_buf = 2 * 2 * tn * 4                         # biases
    compute = 4 * block_b * tn * 4                 # ph, pt, h, t f32 live values
    need = x_buf + o_buf + w_buf + b_buf + compute
    # ~30% headroom; never below the 32 MiB default, never above v7x's 64 MiB.
    return int(min(64 << 20, max(32 << 20, int(need * 1.3))))


def highway(x, wh_t, bh, wt_t, bt, *, block_b=None, column_tile=None, interpret=False):
    """Highway forward: z = t*h + (1-t)*x, h = relu(x@Wh+bh), t = sigmoid(x@Wt+bt).

    x:          (B, F) activations (stays f32 into the kernel; residual/tail exact f32).
    wh_t, wt_t: (F, F) weights in (in_features, out_features) layout, already in the
                matmul dtype (see prepare_highway_params).
    bh, bt:     (1, F) float32 biases.
    """
    B, F = x.shape
    assert wh_t.shape == (F, F) and wt_t.shape == (F, F)
    assert bh.shape == (1, F) and bt.shape == (1, F)

    x_it = jnp.dtype(x.dtype).itemsize
    w_it = jnp.dtype(wh_t.dtype).itemsize
    o_it = x_it

    if block_b is None:
        block_b = _default_block_b(B, F, x_it)
    tn = column_tile if column_tile is not None else _default_tn(F, w_it)
    if tn != F and (F % tn != 0 or tn % _LANE != 0):
        raise ValueError(f"column_tile={tn} must divide F={F} and be a multiple of {_LANE}")
    col_tiled = tn != F

    n_b = pl.cdiv(B, block_b)
    n_col = F // tn
    # Column axis outermost, batch axis innermost (fastest): the (F, tn) weight
    # blocks keep a constant index across the inner batch sweep, so the full
    # weights are streamed from HBM exactly once per call.
    grid = (n_col, n_b)

    in_specs = [
        pl.BlockSpec((block_b, F), lambda j, i: (i, 0)),   # x
        pl.BlockSpec((F, tn), lambda j, i: (0, j)),        # Wh
        pl.BlockSpec((F, tn), lambda j, i: (0, j)),        # Wt
        pl.BlockSpec((1, tn), lambda j, i: (0, j)),        # bh
        pl.BlockSpec((1, tn), lambda j, i: (0, j)),        # bt
    ]
    out_spec = pl.BlockSpec((block_b, tn), lambda j, i: (i, j))

    cost = pl.CostEstimate(
        flops=2 * 2 * B * F * F + 6 * B * F,
        transcendentals=B * F,
        bytes_accessed=(2 * F * F * w_it          # weights streamed once
                        + 2 * F * 4               # biases
                        + n_col * B * F * x_it    # x (re-streamed per column tile)
                        + B * F * o_it),          # output
    )

    return pl.pallas_call(
        functools.partial(_highway_kernel, tn=tn, col_tiled=col_tiled),
        out_shape=jax.ShapeDtypeStruct((B, F), x.dtype),
        grid_spec=pltpu.PrefetchScalarGridSpec(
            num_scalar_prefetch=0,
            grid=grid,
            in_specs=in_specs,
            out_specs=out_spec,
        ),
        compiler_params=pltpu.CompilerParams(
            dimension_semantics=("parallel", "parallel"),
            vmem_limit_bytes=_vmem_limit_bytes(block_b, F, tn, x_it, w_it, o_it),
        ),
        cost_estimate=cost,
        interpret=interpret,
    )(x, wh_t, wt_t, bh, bt)


def highway_ref(x, wh, bh, wt, bt):
    """Pure-JAX reference with PyTorch nn.Linear semantics (W is (out, in))."""
    h = jnp.maximum(x @ wh.T + bh, 0.0)
    t = jax.nn.sigmoid(x @ wt.T + bt)
    return t * h + (1.0 - t) * x


def highway_ref_mixed(x, wh, bh, wt, bt, mm_dtype):
    """Reference for the mixed-precision path: matmul in mm_dtype (f32 acc), rest f32."""
    xm = x.astype(mm_dtype)
    ph = jnp.dot(xm, wh.T.astype(mm_dtype), preferred_element_type=jnp.float32) + bh
    pt = jnp.dot(xm, wt.T.astype(mm_dtype), preferred_element_type=jnp.float32) + bt
    h = jnp.maximum(ph, 0.0)
    t = jax.nn.sigmoid(pt)
    return t * h + (1.0 - t) * x


if __name__ == "__main__":
    key = jax.random.PRNGKey(0)

    def make_params(k, F):
        kwh, kbh, kwt, kbt = jax.random.split(k, 4)
        bound = 1.0 / (F ** 0.5)
        wh = jax.random.uniform(kwh, (F, F), jnp.float32, -bound, bound)  # (out, in)
        bh = jax.random.uniform(kbh, (F,), jnp.float32, -bound, bound)
        wt = jax.random.uniform(kwt, (F, F), jnp.float32, -bound, bound)
        bt = jax.random.uniform(kbt, (F,), jnp.float32, -bound, bound)
        return wh, bh, wt, bt

    # --- 1) f32 path, small shape (B=8, F=128) — matches PyTorch numerics ---
    B, F = 8, 128
    kx, kp, kx2, kp2 = jax.random.split(key, 4)
    x = jax.random.normal(kx, (B, F), jnp.float32)
    wh, bh, wt, bt = make_params(kp, F)
    params_f32 = prepare_highway_params(wh, bh, wt, bt)            # once, at "init"
    out = jax.block_until_ready(highway(x, *params_f32))
    ref = highway_ref(x, wh, bh, wt, bt)
    assert out.shape == (B, F) and out.dtype == jnp.float32
    assert jnp.allclose(out, ref, atol=2e-4, rtol=2e-4), "f32 path mismatch"

    # --- 2) bf16 matmul path (MXU-native on v5e/v6e), residual/tail exact f32 ---
    params_bf16 = prepare_highway_params(wh, bh, wt, bt, matmul_dtype=jnp.bfloat16)
    out_bf = jax.block_until_ready(highway(x, *params_bf16))
    ref_bf = highway_ref_mixed(x, wh, bh, wt, bt, jnp.bfloat16)
    assert out_bf.shape == (B, F) and out_bf.dtype == jnp.float32
    assert jnp.allclose(out_bf, ref_bf, atol=2e-2, rtol=2e-2), "bf16 path mismatch"

    # --- 3) multi-step grid: batch tiling + output-column (N) tiling ---
    B2, F2 = 32, 256
    x2 = jax.random.normal(kx2, (B2, F2), jnp.float32)
    wh2, bh2, wt2, bt2 = make_params(kp2, F2)
    p2 = prepare_highway_params(wh2, bh2, wt2, bt2)
    out2 = jax.block_until_ready(highway(x2, *p2, block_b=8, column_tile=128))
    ref2 = highway_ref(x2, wh2, bh2, wt2, bt2)
    assert out2.shape == (B2, F2)
    assert jnp.allclose(out2, ref2, atol=2e-4, rtol=2e-4), "tiled path mismatch"

    print("KERNEL_OK")
</pallas_src>

<mosaic_0001>
module attributes {stable_mosaic.version = 11 : i64} {
  func.func @_highway_kernel(%arg0: i32, %arg1: i32, %arg2: memref<8x128xf32, #tpu.memory_space<vmem>>, %arg3: memref<128x128xf32, #tpu.memory_space<vmem>>, %arg4: memref<128x128xf32, #tpu.memory_space<vmem>>, %arg5: memref<1x128xf32, #tpu.memory_space<vmem>>, %arg6: memref<1x128xf32, #tpu.memory_space<vmem>>, %arg7: memref<8x128xf32, #tpu.memory_space<vmem>>) attributes {dimension_semantics = [#tpu.dimension_semantics<parallel>, #tpu.dimension_semantics<parallel>], iteration_bounds = array<i64: 1, 1>, scalar_prefetch = 0 : i64, scratch_operands = 0 : i64, tpu.core_type = #tpu.core_type<tc>, window_params = [{transform_indices = @transform_0, window_bounds = array<i64: 8, 128>}, {transform_indices = @transform_1, window_bounds = array<i64: 128, 128>}, {transform_indices = @transform_2, window_bounds = array<i64: 128, 128>}, {transform_indices = @transform_3, window_bounds = array<i64: 1, 128>}, {transform_indices = @transform_4, window_bounds = array<i64: 1, 128>}, {transform_indices = @transform_5, window_bounds = array<i64: 8, 128>}]} {
    %c0 = arith.constant 0 : index
    %c0_0 = arith.constant 0 : index
    %0 = vector.load %arg2[%c0, %c0_0] : memref<8x128xf32, #tpu.memory_space<vmem>>, vector<8x128xf32>
    %c0_1 = arith.constant 0 : index
    %c0_2 = arith.constant 0 : index
    %1 = vector.load %arg3[%c0_1, %c0_2] : memref<128x128xf32, #tpu.memory_space<vmem>>, vector<128x128xf32>
    %cst = arith.constant dense<0.000000e+00> : vector<8x128xf32>
    %2 = tpu.matmul %0, %1, %cst {dimension_numbers = #tpu.dot_dimension_numbers<[1], [0], [0], [1], [0, 0, 1, 1], [], []>} : vector<8x128xf32>, vector<128x128xf32>, vector<8x128xf32> -> vector<8x128xf32>
    %c0_3 = arith.constant 0 : index
    %c0_4 = arith.constant 0 : index
    %3 = vector.load %arg5[%c0_3, %c0_4] : memref<1x128xf32, #tpu.memory_space<vmem>>, vector<1x128xf32>
    %4 = vector.broadcast %3 : vector<1x128xf32> to vector<8x128xf32>
    %5 = arith.addf %2, %4 : vector<8x128xf32>
    %c0_5 = arith.constant 0 : index
    %c0_6 = arith.constant 0 : index
    %6 = vector.load %arg4[%c0_5, %c0_6] : memref<128x128xf32, #tpu.memory_space<vmem>>, vector<128x128xf32>
    %cst_7 = arith.constant dense<0.000000e+00> : vector<8x128xf32>
    %7 = tpu.matmul %0, %6, %cst_7 {dimension_numbers = #tpu.dot_dimension_numbers<[1], [0], [0], [1], [0, 0, 1, 1], [], []>} : vector<8x128xf32>, vector<128x128xf32>, vector<8x128xf32> -> vector<8x128xf32>
    %c0_8 = arith.constant 0 : index
    %c0_9 = arith.constant 0 : index
    %8 = vector.load %arg6[%c0_8, %c0_9] : memref<1x128xf32, #tpu.memory_space<vmem>>, vector<1x128xf32>
    %9 = vector.broadcast %8 : vector<1x128xf32> to vector<8x128xf32>
    %10 = arith.addf %7, %9 : vector<8x128xf32>
    %cst_10 = arith.constant 0.000000e+00 : f32
    %11 = vector.broadcast %cst_10 : f32 to vector<8x128xf32>
    %12 = arith.maximumf %5, %11 : vector<8x128xf32>
    %13 = arith.negf %10 : vector<8x128xf32>
    %14 = math.exp %13 : vector<8x128xf32>
    %cst_11 = arith.constant 1.000000e+00 : f32
    %15 = vector.broadcast %cst_11 : f32 to vector<8x128xf32>
    %16 = arith.addf %15, %14 : vector<8x128xf32>
    %17 = arith.divf %15, %16 : vector<8x128xf32>
    %18 = arith.subf %12, %0 : vector<8x128xf32>
    %19 = arith.mulf %17, %18 : vector<8x128xf32>
    %20 = arith.addf %19, %0 : vector<8x128xf32>
    %c0_12 = arith.constant 0 : index
    %c0_13 = arith.constant 0 : index
    %21 = vector.load %arg7[%c0_12, %c0_13] : memref<8x128xf32, #tpu.memory_space<vmem>>, vector<8x128xf32>
    tpu.vector_store %arg7[%c0_12, %c0_13], %20 {strides = array<i32>} : memref<8x128xf32, #tpu.memory_space<vmem>>, vector<8x128xf32>,
    return
  }
  func.func @transform_0(%arg0: i32, %arg1: i32) -> (i32, i32) {
    %c0_i32 = arith.constant 0 : i32
    %c0_i32_0 = arith.constant 0 : i32
    return %arg1, %c0_i32 : i32, i32
  }
  func.func @transform_1(%arg0: i32, %arg1: i32) -> (i32, i32) {
    %c0_i32 = arith.constant 0 : i32
    %c0_i32_0 = arith.constant 0 : i32
    return %c0_i32, %arg0 : i32, i32
  }
  func.func @transform_2(%arg0: i32, %arg1: i32) -> (i32, i32) {
    %c0_i32 = arith.constant 0 : i32
    %c0_i32_0 = arith.constant 0 : i32
    return %c0_i32, %arg0 : i32, i32
  }
  func.func @transform_3(%arg0: i32, %arg1: i32) -> (i32, i32) {
    %c0_i32 = arith.constant 0 : i32
    %c0_i32_0 = arith.constant 0 : i32
    return %c0_i32, %arg0 : i32, i32
  }
  func.func @transform_4(%arg0: i32, %arg1: i32) -> (i32, i32) {
    %c0_i32 = arith.constant 0 : i32
    %c0_i32_0 = arith.constant 0 : i32
    return %c0_i32, %arg0 : i32, i32
  }
  func.func @transform_5(%arg0: i32, %arg1: i32) -> (i32, i32) {
    %c0_i32 = arith.constant 0 : i32
    return %arg1, %arg0 : i32, i32
  }
}

</mosaic_0001>

<bundles_post_ra>
// kernel: tpu_custom_call.1
= control target key start
LH: loop header
LB: loop body
LE: loop exit
PB: predicated region body
PF: predicated region fallthrough
CT: control target
= control target key end

     0   :  { %10 = vsyncpa [#allocation3], 0  ;;  %s569_s0 = inlined_call_operand.hbm [shape: f32[8,128], index: 0, kind: input, shape index: {}]   ;;  %s570_s1 = inlined_call_operand.hbm [shape: f32[128,128], index: 1, kind: input, shape index: {}]   ;;  %s571_s2 = inlined_call_operand.hbm [shape: f32[128,128], index: 2, kind: input, shape index: {}]   ;;  %s572_s3 = inlined_call_operand.vmem [shape: f32[1,128], index: 3, kind: input, shape index: {}]   ;;  %s573_s4 = inlined_call_operand.vmem [shape: f32[1,128], index: 4, kind: input, shape index: {}]   ;;  %s574_s5 = inlined_call_operand.hbm [shape: f32[8,128], index: 5, kind: output, shape index: {}]  }
   0x1   :  { %11 = vsyncpa [#allocation6], 0 }
   0x2   :  { %12 = vsyncpa [#allocation4], 0  ;;  %s479_s18 = smov [#allocation5]  }
   0x3   :  { %s28_s19 = sshll.u32 %s479_s18, 4  ;;  %s29_s19 = int_to_ptr.vmem [resolvable:$true] %s28_s19 }
   0x4   :  { %s401_s20 = scalar_lea.vmem %s29_s19, 2048  ;;  %p406_p1 = scmp.lt.s32.totalorder %s29_s19, %s29_s19 }
   0x5   :  { %p402_p0 = scmp.ne.s32.totalorder %s29_s19, %s401_s20  ;;  %p407_p2 = scmp.lt.s32.totalorder %s401_s20, %s401_s20 }
   0x7   :  { %p408_p3 = por %p407_p2, %p406_p1 }
   0x9   :  { %p409_p4 = pnand %p408_p3, %p402_p0 }
   0xb   :  { %412 = shalt.err (!%p409_p4)
}
   0xc   :  { %s480_s21 = smov 128   ;;  %s481_s22 = smov 8  }
   0xd   :  { %34 = dma.hbm_to_vmem [thread:$0]  %s570_s1, 2048, %s29_s19, [#allocation6], %s480_s21, %s480_s21, %s481_s22  }
   0xe   :  { %s482_s25 = smov [#allocation2]   ;;  %s483_s27 = smov [#allocation7]  }
   0xf   :  { %s19_s26 = sshll.u32 %s482_s25, 4  ;;  %s40_s28 = sshll.u32 %s483_s27, 4  ;;  %s20_s26 = int_to_ptr.vmem [resolvable:$true] %s19_s26  ;;  %s41_s28 = int_to_ptr.vmem [resolvable:$true] %s40_s28 }
  0x10   :  { %s421_s29 = scalar_lea.vmem %s20_s26, 128  ;;  %p426_p6 = scmp.lt.s32.totalorder %s20_s26, %s20_s26 }
  0x11   :  { %p422_p5 = scmp.ne.s32.totalorder %s20_s26, %s421_s29  ;;  %p427_p7 = scmp.lt.s32.totalorder %s421_s29, %s421_s29 }
  0x13   :  { %p428_p8 = por %p427_p7, %p426_p6 }
  0x15   :  { %p429_p9 = pnand %p428_p8, %p422_p5 }
  0x17   :  { %432 = shalt.err (!%p429_p9)
}
  0x18   :  { %22 = dma.hbm_to_vmem [thread:$0]  %s569_s0, 128, %s20_s26, [#allocation3]  }
  0x19   :  { %s441_s7 = scalar_lea.vmem %s41_s28, 2048  ;;  %p446_p11 = scmp.lt.s32.totalorder %s41_s28, %s41_s28 }
  0x1a   :  { %p442_p10 = scmp.ne.s32.totalorder %s41_s28, %s441_s7  ;;  %p447_p12 = scmp.lt.s32.totalorder %s441_s7, %s441_s7 }
  0x1c   :  { %p448_p13 = por %p447_p12, %p446_p11 }
  0x1e   :  { %p449_p0 = pnand %p448_p13, %p442_p10 }
  0x20   :  { %452 = shalt.err (!%p449_p0)
}
  0x21   :  { %46 = dma.hbm_to_vmem [thread:$0]  %s571_s2, 2048, %s41_s28, [#allocation6], %s480_s21, %s480_s21, %s481_s22  }
  0x22   :  { %473 = dma.done.wait [#allocation3], 128  }
  0x23   :  { %474 = vsyncadd [#allocation3], 4294967168 }
  0x24   :  { %475 = dma.done.wait [#allocation6], 4096  }
  0x25   :  { %476 = vsyncadd [#allocation6], 4294963200  ;;  %v484_v0 = vmov 0.0   ;;  %vm485_vm0 = vmmov 0   ;;  %v169_v1 = vld [vmem:[#allocation7 + $0x78] sm:$0xff]  ;;  %v168_v2 = vld [vmem:[#allocation7 + $0x70] sm:$0xff] }
  0x26   :  { %346 = vmatprep.subr.mxu1 %v484_v0  ;;  %311 = vmatprep.subr.mxu0 %v484_v0  ;;  %v167_v3 = vld [vmem:[#allocation7 + $0x68] sm:$0xff]  ;;  %v166_v4 = vld [vmem:[#allocation7 + $0x60] sm:$0xff]  ;;  %v76_v5 = vld [vmem:[#allocation5 + $0x78] sm:$0xff]  ;;  %s486_s11 = smov [#allocation8]  }
  0x27   :  { %378 = vmatprep.mubr.msk.f32.mxu1 %vm485_vm0, %v484_v0  ;;  %343 = vmatprep.mubr.msk.f32.mxu0 %vm485_vm0, %v484_v0  ;;  %v75_v6 = vld [vmem:[#allocation5 + $0x70] sm:$0xff]  ;;  %v165_v7 = vld [vmem:[#allocation7 + $0x58] sm:$0xff]  ;;  %v74_v8 = vld [vmem:[#allocation5 + $0x68] sm:$0xff] }
  0x28   :  { %347 = vmatpush3.msra.mxu1 %v169_v1  ;;  %312 = vmatpush3.msra.mxu0 %v76_v5  ;;  %v164_v9 = vld [vmem:[#allocation7 + $0x50] sm:$0xff]  ;;  %v73_v10 = vld [vmem:[#allocation5 + $0x60] sm:$0xff]  ;;  %v163_v11 = vld [vmem:[#allocation7 + $0x48] sm:$0xff] }
  0x29   :  { %348 = vmatprep.subr.mxu1 %v484_v0  ;;  %313 = vmatprep.subr.mxu0 %v484_v0  ;;  %v72_v12 = vld [vmem:[#allocation5 + $0x58] sm:$0xff]  ;;  %v162_v13 = vld [vmem:[#allocation7 + $0x40] sm:$0xff]  ;;  %v71_v14 = vld [vmem:[#allocation5 + $0x50] sm:$0xff] }
  0x2a   :  { %349 = vmatpush3.msra.mxu1 %v168_v2  ;;  %314 = vmatpush3.msra.mxu0 %v75_v6  ;;  %v161_v15 = vld [vmem:[#allocation7 + $0x38] sm:$0xff]  ;;  %v70_v16 = vld [vmem:[#allocation5 + $0x48] sm:$0xff]  ;;  %v160_v17 = vld [vmem:[#allocation7 + $0x30] sm:$0xff] }
  0x2b   :  { %350 = vmatprep.subr.mxu1 %v484_v0  ;;  %315 = vmatprep.subr.mxu0 %v484_v0  ;;  %v69_v18 = vld [vmem:[#allocation5 + $0x40] sm:$0xff]  ;;  %v159_v19 = vld [vmem:[#allocation7 + $0x28] sm:$0xff]  ;;  %v68_v20 = vld [vmem:[#allocation5 + $0x38] sm:$0xff] }
  0x2c   :  { %351 = vmatpush3.msra.mxu1 %v167_v3  ;;  %316 = vmatpush3.msra.mxu0 %v74_v8  ;;  %v158_v21 = vld [vmem:[#allocation7 + $0x20] sm:$0xff]  ;;  %v67_v22 = vld [vmem:[#allocation5 + $0x30] sm:$0xff]  ;;  %v157_v23 = vld [vmem:[#allocation7 + $0x18] sm:$0xff] }
  0x2d   :  { %352 = vmatprep.subr.mxu1 %v484_v0  ;;  %317 = vmatprep.subr.mxu0 %v484_v0  ;;  %v66_v24 = vld [vmem:[#allocation5 + $0x28] sm:$0xff]  ;;  %v156_v25 = vld [vmem:[#allocation7 + $0x10] sm:$0xff]  ;;  %v65_v26 = vld [vmem:[#allocation5 + $0x20] sm:$0xff] }
  0x2e   :  { %353 = vmatpush3.msra.mxu1 %v166_v4  ;;  %318 = vmatpush3.msra.mxu0 %v73_v10  ;;  %v155_v27 = vld [vmem:[#allocation7 + $0x8] sm:$0xff]  ;;  %v64_v28 = vld [vmem:[#allocation5 + $0x18] sm:$0xff]  ;;  %v154_v29 = vld [vmem:[#allocation7] sm:$0xff] }
  0x2f   :  { %354 = vmatprep.subr.mxu1 %v484_v0  ;;  %319 = vmatprep.subr.mxu0 %v484_v0  ;;  %v63_v30 = vld [vmem:[#allocation5 + $0x10] sm:$0xff]  ;;  %v60_v31 = vld [vmem:[#allocation2] sm:$0xff]  ;;  %v62_v32 = vld [vmem:[#allocation5 + $0x8] sm:$0xff] }
  0x30   :  { %355 = vmatpush3.msra.mxu1 %v165_v7  ;;  %320 = vmatpush3.msra.mxu0 %v72_v12  ;;  %v61_v33 = vld [vmem:[#allocation5] sm:$0xff]  ;;  %v275_v34 = vld [vmem:[%s573_s4] ss:$0 sm:$0xff]  ;;  %s264_s4 = sshll.u32 %s486_s11, 4  ;;  %s265_s4 = int_to_ptr.vmem [resolvable:$true] %s264_s4 }
  0x31   :  { %356 = vmatprep.subr.mxu1 %v484_v0  ;;  %321 = vmatprep.subr.mxu0 %v484_v0  ;;  %v274_v43 = vld [vmem:[%s572_s3] ss:$0 sm:$0xff]  ;;  %s453_s12 = scalar_lea.vmem %s265_s4, 128  ;;  %p458_p2 = scmp.lt.s32.totalorder %s265_s4, %s265_s4 }
  0x32   :  { %357 = vmatpush3.msra.mxu1 %v164_v9  ;;  %322 = vmatpush3.msra.mxu0 %v71_v14  ;;  %p454_p1 = scmp.ne.s32.totalorder %s265_s4, %s453_s12  ;;  %p459_p3 = scmp.lt.s32.totalorder %s453_s12, %s453_s12 }
  0x33   :  { %358 = vmatprep.subr.mxu1 %v484_v0  ;;  %323 = vmatprep.subr.mxu0 %v484_v0 }
  0x34   :  { %359 = vmatpush3.msra.mxu1 %v163_v11  ;;  %324 = vmatpush3.msra.mxu0 %v70_v16  ;;  %p460_p4 = por %p459_p3, %p458_p2 }
  0x35   :  { %360 = vmatprep.subr.mxu1 %v484_v0  ;;  %325 = vmatprep.subr.mxu0 %v484_v0 }
  0x36   :  { %361 = vmatpush3.msra.mxu1 %v162_v13  ;;  %326 = vmatpush3.msra.mxu0 %v69_v18  ;;  %p461_p5 = pnand %p460_p4, %p454_p1 }
  0x37   :  { %362 = vmatprep.subr.mxu1 %v484_v0  ;;  %327 = vmatprep.subr.mxu0 %v484_v0 }
  0x38   :  { %363 = vmatpush3.msra.mxu1 %v161_v15  ;;  %328 = vmatpush3.msra.mxu0 %v68_v20 }
  0x39   :  { %364 = vmatprep.subr.mxu1 %v484_v0  ;;  %329 = vmatprep.subr.mxu0 %v484_v0 }
  0x3a   :  { %365 = vmatpush3.msra.mxu1 %v160_v17  ;;  %330 = vmatpush3.msra.mxu0 %v67_v22 }
  0x3b   :  { %366 = vmatprep.subr.mxu1 %v484_v0  ;;  %331 = vmatprep.subr.mxu0 %v484_v0 }
  0x3c   :  { %367 = vmatpush3.msra.mxu1 %v159_v19  ;;  %332 = vmatpush3.msra.mxu0 %v66_v24 }
  0x3d   :  { %368 = vmatprep.subr.mxu1 %v484_v0  ;;  %333 = vmatprep.subr.mxu0 %v484_v0 }
  0x3e   :  { %369 = vmatpush3.msra.mxu1 %v158_v21  ;;  %334 = vmatpush3.msra.mxu0 %v65_v26 }
  0x3f   :  { %370 = vmatprep.subr.mxu1 %v484_v0  ;;  %335 = vmatprep.subr.mxu0 %v484_v0 }
  0x40   :  { %371 = vmatpush3.msra.mxu1 %v157_v23  ;;  %336 = vmatpush3.msra.mxu0 %v64_v28 }
  0x41   :  { %372 = vmatprep.subr.mxu1 %v484_v0  ;;  %337 = vmatprep.subr.mxu0 %v484_v0 }
  0x42   :  { %373 = vmatpush3.msra.mxu1 %v156_v25  ;;  %338 = vmatpush3.msra.mxu0 %v63_v30 }
  0x43   :  { %374 = vmatprep.subr.mxu1 %v484_v0  ;;  %339 = vmatprep.subr.mxu0 %v484_v0 }
  0x44   :  { %375 = vmatpush3.msra.mxu1 %v155_v27  ;;  %340 = vmatpush3.msra.mxu0 %v62_v32 }
  0x45   :  { %376 = vmatprep.subr.mxu1 %v484_v0  ;;  %341 = vmatprep.subr.mxu0 %v484_v0 }
  0x46   :  { %377 = vmatpush3.msra.mxu1 %v154_v29  ;;  %342 = vmatpush3.msra.mxu0 %v61_v33 }
  0x47   :  { %379 = vmatmul.mubr.f32.vlgmr.msra.gmra.mxu1 %v60_v31  ;;  %344 = vmatmul.mubr.f32.vlgmr.msra.gmra.mxu0 %v60_v31 }
 0x107   :  { %v243_v35 = vpop.f32.mrf.mxu1  ;;  %v150_v39 = vpop.f32.mrf.mxu0 }
 0x108   :  { %v244_v36 = vadd.f32 %v275_v34, %v243_v35  ;;  %v151_v44 = vadd.f32 %v274_v43, %v150_v39 }
 0x109   :  { %v380_v37 = vpop.f32.mrf.mxu1  ;;  %v345_v40 = vpop.f32.mrf.mxu0 }
 0x10a   :  { %v276_v38 = vmul.f32 -1.442695, %v244_v36  ;;  %v247_v45 = vmax.f32 %v151_v44, 0.0 }
 0x10c   :  { %389 = vpow2.f32 %v276_v38  ;;  %v254_v46 = vsub.f32 %v247_v45, %v60_v31 }
 0x119   :  { %v390_v41 = vpop.eup %389 }
 0x11a   :  { %v251_v42 = vadd.f32 1.0, %v390_v41 }
 0x11c   :  { %391 = vrcp.f32 %v251_v42 }
 0x129   :  { %v392_v47 = vpop.eup %391 }
 0x12a   :  { %v255_v48 = vmul.f32 %v392_v47, %v254_v46 }
 0x12c   :  { %v256_v49 = vadd.f32 %v255_v48, %v60_v31 }
 0x12e   :  { %257 = vst [vmem:[#allocation8] sm:$0xff] %v256_v49 }
 0x12f   :  { %464 = shalt.err (!%p461_p5)
}
 0x130   :  { %267 = dma.vmem_to_hbm [thread:$0]  %s265_s4, 128, %s574_s5, [#allocation4]  }
 0x131   :  { %477 = dma.done.wait [#allocation4], 128  }
 0x132   :  { %478 = vsyncadd [#allocation4], 4294967168 }
 0x133   :  { %271 = vsyncpa [#allocation3], 1 }
 0x134   :  { %272 = vsyncpa [#allocation6], 1 }
 0x135   :  { %273 = vsyncpa [#allocation4], 1 }

</bundles_post_ra>
